<compile_context>
chip_gen: v6e
topology: v6e:2x2x1
jax: 0.10.0
libtpu: 0.0.40
codegen_flags: <defaults>
</compile_context>

<pallas_src>
import functools

import jax
import jax.numpy as jnp
from jax.experimental import pallas as pl
from jax.experimental.pallas import tpu as pltpu


_LANE = 128
_SUBLANE = 8
# Scoped-VMEM cap: v7x has 64 MiB per TensorCore (v5e/v6e: 128 MiB).
# 48 MiB leaves headroom for Mosaic internal scratch on every generation.
_VMEM_CAP = 48 << 20


def _round_up(x, m):
    return (x + m - 1) // m * m


def _keep_mask(shape, seed_i32, row_base, n_cols, dropout_p):
    """Deterministic per-element dropout keep-mask from a counter hash.

    Pure jnp/lax ops only (2-D iota, xor, shift, multiply) so it lowers both
    under Mosaic and under interpret mode.  Depends only on the *global*
    (row, col) position and the seed, so it is independent of the tiling.
    """
    rows = jax.lax.broadcasted_iota(jnp.int32, shape, 0) + row_base
    cols = jax.lax.broadcasted_iota(jnp.int32, shape, 1)
    idx = (rows * jnp.int32(n_cols) + cols).astype(jnp.uint32)
    h = idx * jnp.uint32(0x9E3779B1)
    h = h + seed_i32.astype(jnp.uint32) * jnp.uint32(0x85EBCA77)
    h = h ^ (h >> 16)
    h = h * jnp.uint32(0x7FEB352D)
    h = h ^ (h >> 15)
    h = h * jnp.uint32(0x846CA68B)
    h = h ^ (h >> 16)
    # top 24 bits -> signed-int compare (avoids any unsigned-compare corner).
    r24 = (h >> 8).astype(jnp.int32)
    thresh = jnp.int32(min(int(round(dropout_p * (1 << 24))), (1 << 24) - 1))
    return r24 >= thresh


def _ffn_resident_kernel(seed_ref, x_ref, w1_ref, w2_ref, o_ref, *,
                         dropout_p, tile_m, n_cols):
    """Resident-weights path: 1-D grid over token tiles, W1/W2 stay in VMEM."""
    x = x_ref[...]
    h = jnp.dot(x, w1_ref[...], preferred_element_type=jnp.float32)
    h = jnp.maximum(h, 0.0)
    y = jnp.dot(h.astype(w2_ref.dtype), w2_ref[...],
                preferred_element_type=jnp.float32)
    if dropout_p > 0.0:
        row_base = pl.program_id(0) * tile_m          # top level only
        seed = seed_ref[0]
        keep = _keep_mask(y.shape, seed, row_base, n_cols, dropout_p)
        y = jnp.where(keep, y * (1.0 / (1.0 - dropout_p)), 0.0)
    o_ref[...] = y.astype(o_ref.dtype)


def _ffn_stream_kernel(seed_ref, x_ref, w1_ref, w2_ref, o_ref, acc_ref, *,
                       dropout_p, tile_m, n_cols):
    """Hidden-streaming path: grid (token tile i, hidden slice h)."""
    h_idx = pl.program_id(1)
    last = pl.num_programs(1) - 1
    row_base = pl.program_id(0) * tile_m              # top level only
    seed = seed_ref[0]

    x = x_ref[...]
    hp = jnp.maximum(jnp.dot(x, w1_ref[...],
                             preferred_element_type=jnp.float32), 0.0)
    part = jnp.dot(hp.astype(w2_ref.dtype), w2_ref[...],
                   preferred_element_type=jnp.float32)

    @pl.when(h_idx == 0)
    def _():
        acc_ref[...] = part            # direct write, no zero-fill + add

    @pl.when(h_idx != 0)
    def _():
        acc_ref[...] += part

    @pl.when(h_idx == last)
    def _():
        y = acc_ref[...]
        if dropout_p > 0.0:
            keep = _keep_mask(y.shape, seed, row_base, n_cols, dropout_p)
            y = jnp.where(keep, y * (1.0 / (1.0 - dropout_p)), 0.0)
        o_ref[...] = y.astype(o_ref.dtype)


@functools.partial(jax.jit,
                   static_argnames=("dropout_p", "tile_m", "tile_h",
                                    "mxu_bf16"))
def feedforward(x, w1, w2, seed, *, dropout_p=0.0, tile_m=None, tile_h=None,
                mxu_bf16=False):
    """dropout(relu(x @ w1) @ w2).

    x:    (..., C) activations.
    w1:   (C, 4C)  first linear weight, pre-transposed vs nn.Linear.weight.
    w2:   (4C, C)  second linear weight, pre-transposed.
    seed: (1,) int32 dropout seed — vary it per training step.
    """
    orig_shape = x.shape
    out_dtype = x.dtype
    C = x.shape[-1]
    H = w1.shape[1]
    assert w1.shape == (C, H) and w2.shape == (H, C)

    x2d = x.reshape(-1, C)
    M = x2d.shape[0]

    # --- lane-dense feature padding (unmasked stores, full MXU width) ------
    C_pad = _round_up(C, _LANE)
    H_pad = _round_up(H, _LANE)
    if C_pad != C or H_pad != H:
        x2d = jnp.pad(x2d, ((0, 0), (0, C_pad - C)))
        w1 = jnp.pad(w1, ((0, C_pad - C), (0, H_pad - H)))
        w2 = jnp.pad(w2, ((0, H_pad - H), (0, C_pad - C)))

    # --- optional bf16 storage: halves HBM->VMEM bytes, bf16 MXU rate ------
    if mxu_bf16:
        x2d = x2d.astype(jnp.bfloat16)
        w1 = w1.astype(jnp.bfloat16)
        w2 = w2.astype(jnp.bfloat16)

    # --- token tile: big enough to amortize per-step cost, >=2 tiles for
    #     medium/large M so v7x's second TensorCore gets work ---------------
    if tile_m is None:
        if M >= 1024:
            tile_m = 512
        elif M >= 512:
            tile_m = 256
        elif M >= 256:
            tile_m = 128
        else:
            tile_m = _round_up(M, _SUBLANE)
    tile_m = max(_SUBLANE, _round_up(tile_m, _SUBLANE))
    M_pad = _round_up(M, tile_m)
    if M_pad != M:
        x2d = jnp.pad(x2d, ((0, M_pad - M), (0, 0)))

    xsz = jnp.dtype(x2d.dtype).itemsize
    wsz = jnp.dtype(w1.dtype).itemsize
    osz = jnp.dtype(out_dtype).itemsize

    def _vmem_need(th):
        return (2 * tile_m * C_pad * xsz                # x tiles (2 buffers)
                + 2 * (C_pad * th + th * C_pad) * wsz   # W1/W2 (2 buffers)
                + 2 * tile_m * C_pad * osz              # out tiles (2 buffers)
                + tile_m * th * 4                       # f32 intermediate h
                + tile_m * th * wsz                     # cast of h (bf16 path)
                + tile_m * C_pad * 4                    # f32 y before store
                + tile_m * C_pad * 4)                   # accumulator (stream)

    # --- resident weights vs hidden streaming ------------------------------
    if tile_h is None:
        resident = _vmem_need(H_pad) <= int(0.9 * _VMEM_CAP)
    else:
        resident = tile_h >= H_pad

    if resident:
        grid = (M_pad // tile_m,)
        in_specs = [
            pl.BlockSpec(memory_space=pltpu.SMEM),               # seed
            pl.BlockSpec((tile_m, C_pad), lambda i: (i, 0)),     # x tile
            pl.BlockSpec((C_pad, H_pad), lambda i: (0, 0)),      # W1 resident
            pl.BlockSpec((H_pad, C_pad), lambda i: (0, 0)),      # W2 resident
        ]
        out_specs = pl.BlockSpec((tile_m, C_pad), lambda i: (i, 0))
        scratch_shapes = []
        kernel = functools.partial(_ffn_resident_kernel,
                                   dropout_p=float(dropout_p),
                                   tile_m=tile_m, n_cols=C_pad)
        dim_sem = ("parallel",)
        need = _vmem_need(H_pad)
    else:
        if tile_h is None:
            tile_h = 128
            for cand in (2048, 1024, 512, 256):
                if H_pad % cand == 0:
                    tile_h = cand
                    break
        assert H_pad % tile_h == 0 and tile_h % _LANE == 0
        grid = (M_pad // tile_m, H_pad // tile_h)
        in_specs = [
            pl.BlockSpec(memory_space=pltpu.SMEM),                    # seed
            pl.BlockSpec((tile_m, C_pad), lambda i, h: (i, 0)),       # x tile
            pl.BlockSpec((C_pad, tile_h), lambda i, h: (0, h)),       # W1 slice
            pl.BlockSpec((tile_h, C_pad), lambda i, h: (h, 0)),       # W2 slice
        ]
        out_specs = pl.BlockSpec((tile_m, C_pad), lambda i, h: (i, 0))
        scratch_shapes = [pltpu.VMEM((tile_m, C_pad), jnp.float32)]
        kernel = functools.partial(_ffn_stream_kernel,
                                   dropout_p=float(dropout_p),
                                   tile_m=tile_m, n_cols=C_pad)
        dim_sem = ("parallel", "arbitrary")
        need = _vmem_need(tile_h)

    vmem_limit = int(min(max(int(need * 1.25), 32 << 20), _VMEM_CAP))

    out = pl.pallas_call(
        kernel,
        out_shape=jax.ShapeDtypeStruct((M_pad, C_pad), out_dtype),
        grid_spec=pltpu.PrefetchScalarGridSpec(
            num_scalar_prefetch=0,
            grid=grid,
            in_specs=in_specs,
            out_specs=out_specs,
            scratch_shapes=scratch_shapes,
        ),
        compiler_params=pltpu.CompilerParams(
            dimension_semantics=dim_sem,
            vmem_limit_bytes=vmem_limit),
    )(seed, x2d, w1, w2)

    return out[:M, :C].reshape(orig_shape)


if __name__ == "__main__":
    # module config: n_embd=32, precision=float32, fw_dropout in {0.0, 0.1}
    B, T, C = 2, 8, 32
    H = 4 * C
    dtype = jnp.float32

    key = jax.random.PRNGKey(0)
    kx, k1, k2 = jax.random.split(key, 3)
    x = jax.random.normal(kx, (B, T, C), dtype=dtype)
    # nn.Linear stores (out, in); kernel wants x @ W, so pass transposed.
    w1 = (jax.random.normal(k1, (H, C), dtype=dtype) / jnp.sqrt(C)).T
    w2 = (jax.random.normal(k2, (C, H), dtype=dtype) / jnp.sqrt(H)).T
    seed = jnp.array([0], dtype=jnp.int32)

    ref = jnp.maximum(x.reshape(-1, C) @ w1, 0.0) @ w2

    # 1) no dropout: match reference
    y = feedforward(x, w1, w2, seed, dropout_p=0.0)
    jax.block_until_ready(y)
    assert y.shape == x.shape
    assert jnp.allclose(y.reshape(-1, C), ref, atol=1e-4, rtol=1e-4)

    # 2) dropout: every element is 0 or ref/(1-p); some of each
    p = 0.1
    y_d = feedforward(x, w1, w2, seed, dropout_p=p).reshape(-1, C)
    jax.block_until_ready(y_d)
    ref_scaled = ref / (1.0 - p)
    dropped = jnp.abs(y_d) <= 1e-6
    kept_ok = jnp.isclose(y_d, ref_scaled, atol=1e-3, rtol=1e-3)
    assert bool(jnp.all(dropped | kept_ok))
    n_drop = int(jnp.sum(dropped & (jnp.abs(ref_scaled) > 1e-6)))
    assert 0 < n_drop < y_d.size

    # 3) non-128 feature dim + non-divisible token count (padding paths)
    B2, T2, C2 = 3, 100, 96
    H2 = 4 * C2
    kx2, k3, k4 = jax.random.split(jax.random.PRNGKey(1), 3)
    x2 = jax.random.normal(kx2, (B2, T2, C2), dtype=dtype)
    w1b = (jax.random.normal(k3, (H2, C2), dtype=dtype) / jnp.sqrt(C2)).T
    w2b = (jax.random.normal(k4, (C2, H2), dtype=dtype) / jnp.sqrt(H2)).T
    ref2 = jnp.maximum(x2.reshape(-1, C2) @ w1b, 0.0) @ w2b
    y2 = feedforward(x2, w1b, w2b, seed, dropout_p=0.0, tile_m=128)
    jax.block_until_ready(y2)
    assert jnp.allclose(y2.reshape(-1, C2), ref2, atol=1e-3, rtol=1e-3)

    # 4) hidden-streaming fallback path (tile_h < H), with and without dropout
    y3 = feedforward(x2, w1b, w2b, seed, dropout_p=0.0, tile_m=128, tile_h=128)
    jax.block_until_ready(y3)
    assert jnp.allclose(y3.reshape(-1, C2), ref2, atol=1e-3, rtol=1e-3)
    y4 = feedforward(x2, w1b, w2b, seed, dropout_p=p, tile_m=128, tile_h=128)
    y5 = feedforward(x2, w1b, w2b, seed, dropout_p=p, tile_m=128)
    jax.block_until_ready((y4, y5))
    # dropout mask is tiling-independent, so both paths agree
    assert jnp.allclose(y4, y5, atol=1e-3, rtol=1e-3)

    # 5) bf16 storage / MXU path (looser tolerance)
    yb = feedforward(x, w1, w2, seed, dropout_p=0.0, mxu_bf16=True)
    jax.block_until_ready(yb)
    assert jnp.allclose(yb.reshape(-1, C), ref, atol=0.15, rtol=0.1)

    print("KERNEL_OK")
</pallas_src>

<mosaic_0001>
module attributes {stable_mosaic.version = 11 : i64} {
  func.func @_ffn_resident_kernel(%arg0: i32, %arg1: memref<1xi32, #tpu.memory_space<smem>>, %arg2: memref<16x128xf32, #tpu.memory_space<vmem>>, %arg3: memref<128x128xf32, #tpu.memory_space<vmem>>, %arg4: memref<128x128xf32, #tpu.memory_space<vmem>>, %arg5: memref<16x128xf32, #tpu.memory_space<vmem>>) attributes {dimension_semantics = [#tpu.dimension_semantics<parallel>], iteration_bounds = array<i64: 1>, scalar_prefetch = 0 : i64, scratch_operands = 0 : i64, tpu.core_type = #tpu.core_type<tc>, window_params = [{transform_indices = @transform_0, window_bounds = array<i64: 1>}, {transform_indices = @transform_1, window_bounds = array<i64: 16, 128>}, {pipeline_mode = #tpu.pipeline_mode<synchronous>, transform_indices = @transform_2, window_bounds = array<i64: 128, 128>}, {pipeline_mode = #tpu.pipeline_mode<synchronous>, transform_indices = @transform_3, window_bounds = array<i64: 128, 128>}, {transform_indices = @transform_4, window_bounds = array<i64: 16, 128>}]} {
    %c0 = arith.constant 0 : index
    %c0_0 = arith.constant 0 : index
    %0 = vector.load %arg2[%c0, %c0_0] : memref<16x128xf32, #tpu.memory_space<vmem>>, vector<16x128xf32>
    %c0_1 = arith.constant 0 : index
    %c0_2 = arith.constant 0 : index
    %1 = vector.load %arg3[%c0_1, %c0_2] : memref<128x128xf32, #tpu.memory_space<vmem>>, vector<128x128xf32>
    %cst = arith.constant dense<0.000000e+00> : vector<16x128xf32>
    %2 = tpu.matmul %0, %1, %cst {dimension_numbers = #tpu.dot_dimension_numbers<[1], [0], [0], [1], [0, 0, 1, 1], [], []>} : vector<16x128xf32>, vector<128x128xf32>, vector<16x128xf32> -> vector<16x128xf32>
    %cst_3 = arith.constant 0.000000e+00 : f32
    %3 = vector.broadcast %cst_3 : f32 to vector<16x128xf32>
    %4 = arith.maximumf %2, %3 : vector<16x128xf32>
    %c0_4 = arith.constant 0 : index
    %c0_5 = arith.constant 0 : index
    %5 = vector.load %arg4[%c0_4, %c0_5] : memref<128x128xf32, #tpu.memory_space<vmem>>, vector<128x128xf32>
    %cst_6 = arith.constant dense<0.000000e+00> : vector<16x128xf32>
    %6 = tpu.matmul %4, %5, %cst_6 {dimension_numbers = #tpu.dot_dimension_numbers<[1], [0], [0], [1], [0, 0, 1, 1], [], []>} : vector<16x128xf32>, vector<128x128xf32>, vector<16x128xf32> -> vector<16x128xf32>
    %c0_7 = arith.constant 0 : index
    %c0_8 = arith.constant 0 : index
    %7 = vector.load %arg5[%c0_7, %c0_8] : memref<16x128xf32, #tpu.memory_space<vmem>>, vector<16x128xf32>
    tpu.vector_store %arg5[%c0_7, %c0_8], %6 {strides = array<i32>} : memref<16x128xf32, #tpu.memory_space<vmem>>, vector<16x128xf32>,
    return
  }
  func.func @transform_0(%arg0: i32) -> i32 {
    %c0_i32 = arith.constant 0 : i32
    %c0_i32_0 = arith.constant 0 : i32
    return %c0_i32 : i32
  }
  func.func @transform_1(%arg0: i32) -> (i32, i32) {
    %c0_i32 = arith.constant 0 : i32
    %c0_i32_0 = arith.constant 0 : i32
    return %arg0, %c0_i32 : i32, i32
  }
  func.func @transform_2(%arg0: i32) -> (i32, i32) {
    %c0_i32 = arith.constant 0 : i32
    %c0_i32_0 = arith.constant 0 : i32
    %c0_i32_1 = arith.constant 0 : i32
    return %c0_i32, %c0_i32_0 : i32, i32
  }
  func.func @transform_3(%arg0: i32) -> (i32, i32) {
    %c0_i32 = arith.constant 0 : i32
    %c0_i32_0 = arith.constant 0 : i32
    %c0_i32_1 = arith.constant 0 : i32
    return %c0_i32, %c0_i32_0 : i32, i32
  }
  func.func @transform_4(%arg0: i32) -> (i32, i32) {
    %c0_i32 = arith.constant 0 : i32
    %c0_i32_0 = arith.constant 0 : i32
    return %arg0, %c0_i32 : i32, i32
  }
}

</mosaic_0001>

<bundles_post_ra>
// kernel: feedforward.1
= control target key start
LH: loop header
LB: loop body
LE: loop exit
PB: predicated region body
PF: predicated region fallthrough
CT: control target
= control target key end

     0   :  { %s449_s0 = inlined_call_operand.<no memory space> [shape: s32[1], index: 0, kind: input, shape index: {}]   ;;  %s450_s2 = inlined_call_operand.vmem [shape: f32[128,128], index: 2, kind: input, shape index: {}]   ;;  %s451_s1 = inlined_call_operand.vmem [shape: f32[16,128], index: 1, kind: input, shape index: {}]   ;;  %s452_s3 = inlined_call_operand.vmem [shape: f32[128,128], index: 3, kind: input, shape index: {}]   ;;  %s453_s4 = inlined_call_operand.vmem [shape: f32[16,128], index: 4, kind: output, shape index: {}]  }
   0x1   :  { %v35_v0 = vld [vmem:[%s450_s2 + $0x78] sm:$0xff]  ;;  %v34_v1 = vld [vmem:[%s450_s2 + $0x70] sm:$0xff]  ;;  %v33_v2 = vld [vmem:[%s450_s2 + $0x68] sm:$0xff] }
   0x2   :  { %246 = vmatprep.subr.mxu0 %v35_v0  ;;  %v32_v3 = vld [vmem:[%s450_s2 + $0x60] sm:$0xff]  ;;  %v31_v5 = vld [vmem:[%s450_s2 + $0x58] sm:$0xff]  ;;  %v127_v7 = vld [vmem:[%s452_s3 + $0x70] sm:$0xff] }
   0x3   :  { %247 = vmatpush3.msra.mxu0 %v35_v0  ;;  %v18_v4 = vld [vmem:[%s451_s1] sm:$0xff]  ;;  %v128_v6 = vld [vmem:[%s452_s3 + $0x78] sm:$0xff]  ;;  %v30_v8 = vld [vmem:[%s450_s2 + $0x50] sm:$0xff] }
   0x4   :  { %248 = vmatprep.subr.mxu0 %v34_v1  ;;  %278 = vmatprep.mubr.f32.mxu0 %v18_v4  ;;  %v126_v9 = vld [vmem:[%s452_s3 + $0x68] sm:$0xff]  ;;  %v125_v11 = vld [vmem:[%s452_s3 + $0x60] sm:$0xff]  ;;  %v124_v13 = vld [vmem:[%s452_s3 + $0x58] sm:$0xff] }
   0x5   :  { %249 = vmatpush3.msra.mxu0 %v34_v1  ;;  %281 = vmatprep.subr.mxu1 %v128_v6  ;;  %v29_v10 = vld [vmem:[%s450_s2 + $0x48] sm:$0xff]  ;;  %v28_v12 = vld [vmem:[%s450_s2 + $0x40] sm:$0xff]  ;;  %v27_v14 = vld [vmem:[%s450_s2 + $0x38] sm:$0xff] }
   0x6   :  { %250 = vmatprep.subr.mxu0 %v33_v2  ;;  %282 = vmatpush3.msra.mxu1 %v128_v6  ;;  %v123_v15 = vld [vmem:[%s452_s3 + $0x50] sm:$0xff]  ;;  %v122_v17 = vld [vmem:[%s452_s3 + $0x48] sm:$0xff]  ;;  %v121_v19 = vld [vmem:[%s452_s3 + $0x40] sm:$0xff] }
   0x7   :  { %251 = vmatpush3.msra.mxu0 %v33_v2  ;;  %283 = vmatprep.subr.mxu1 %v127_v7  ;;  %v26_v16 = vld [vmem:[%s450_s2 + $0x30] sm:$0xff]  ;;  %v25_v18 = vld [vmem:[%s450_s2 + $0x28] sm:$0xff]  ;;  %v24_v20 = vld [vmem:[%s450_s2 + $0x20] sm:$0xff] }
   0x8   :  { %252 = vmatprep.subr.mxu0 %v32_v3  ;;  %284 = vmatpush3.msra.mxu1 %v127_v7  ;;  %v120_v21 = vld [vmem:[%s452_s3 + $0x38] sm:$0xff]  ;;  %v119_v23 = vld [vmem:[%s452_s3 + $0x30] sm:$0xff]  ;;  %v118_v25 = vld [vmem:[%s452_s3 + $0x28] sm:$0xff] }
   0x9   :  { %253 = vmatpush3.msra.mxu0 %v32_v3  ;;  %285 = vmatprep.subr.mxu1 %v126_v9  ;;  %v23_v22 = vld [vmem:[%s450_s2 + $0x18] sm:$0xff]  ;;  %v22_v24 = vld [vmem:[%s450_s2 + $0x10] sm:$0xff]  ;;  %v21_v26 = vld [vmem:[%s450_s2 + $0x8] sm:$0xff] }
   0xa   :  { %254 = vmatprep.subr.mxu0 %v31_v5  ;;  %286 = vmatpush3.msra.mxu1 %v126_v9  ;;  %v117_v27 = vld [vmem:[%s452_s3 + $0x20] sm:$0xff]  ;;  %v116_v29 = vld [vmem:[%s452_s3 + $0x18] sm:$0xff]  ;;  %v19_v30 = vld [vmem:[%s451_s1 + $0x8] sm:$0xff] }
   0xb   :  { %255 = vmatpush3.msra.mxu0 %v31_v5  ;;  %287 = vmatprep.subr.mxu1 %v125_v11  ;;  %v20_v28 = vld [vmem:[%s450_s2] sm:$0xff]  ;;  %v115_v31 = vld [vmem:[%s452_s3 + $0x10] sm:$0xff]  ;;  %v114_v32 = vld [vmem:[%s452_s3 + $0x8] sm:$0xff] }
   0xc   :  { %256 = vmatprep.subr.mxu0 %v30_v8  ;;  %288 = vmatpush3.msra.mxu1 %v125_v11  ;;  %v113_v33 = vld [vmem:[%s452_s3] sm:$0xff] }
   0xd   :  { %257 = vmatpush3.msra.mxu0 %v30_v8  ;;  %289 = vmatprep.subr.mxu1 %v124_v13 }
   0xe   :  { %258 = vmatprep.subr.mxu0 %v29_v10  ;;  %290 = vmatpush3.msra.mxu1 %v124_v13 }
   0xf   :  { %259 = vmatpush3.msra.mxu0 %v29_v10  ;;  %291 = vmatprep.subr.mxu1 %v123_v15 }
  0x10   :  { %260 = vmatprep.subr.mxu0 %v28_v12  ;;  %292 = vmatpush3.msra.mxu1 %v123_v15 }
  0x11   :  { %261 = vmatpush3.msra.mxu0 %v28_v12  ;;  %293 = vmatprep.subr.mxu1 %v122_v17 }
  0x12   :  { %262 = vmatprep.subr.mxu0 %v27_v14  ;;  %294 = vmatpush3.msra.mxu1 %v122_v17 }
  0x13   :  { %263 = vmatpush3.msra.mxu0 %v27_v14  ;;  %295 = vmatprep.subr.mxu1 %v121_v19 }
  0x14   :  { %264 = vmatprep.subr.mxu0 %v26_v16  ;;  %296 = vmatpush3.msra.mxu1 %v121_v19 }
  0x15   :  { %265 = vmatpush3.msra.mxu0 %v26_v16  ;;  %297 = vmatprep.subr.mxu1 %v120_v21 }
  0x16   :  { %266 = vmatprep.subr.mxu0 %v25_v18  ;;  %298 = vmatpush3.msra.mxu1 %v120_v21 }
  0x17   :  { %267 = vmatpush3.msra.mxu0 %v25_v18  ;;  %299 = vmatprep.subr.mxu1 %v119_v23 }
  0x18   :  { %268 = vmatprep.subr.mxu0 %v24_v20  ;;  %300 = vmatpush3.msra.mxu1 %v119_v23 }
  0x19   :  { %269 = vmatpush3.msra.mxu0 %v24_v20  ;;  %301 = vmatprep.subr.mxu1 %v118_v25 }
  0x1a   :  { %270 = vmatprep.subr.mxu0 %v23_v22  ;;  %302 = vmatpush3.msra.mxu1 %v118_v25 }
  0x1b   :  { %271 = vmatpush3.msra.mxu0 %v23_v22  ;;  %303 = vmatprep.subr.mxu1 %v117_v27 }
  0x1c   :  { %272 = vmatprep.subr.mxu0 %v22_v24  ;;  %304 = vmatpush3.msra.mxu1 %v117_v27 }
  0x1d   :  { %273 = vmatpush3.msra.mxu0 %v22_v24  ;;  %305 = vmatprep.subr.mxu1 %v116_v29 }
  0x1e   :  { %274 = vmatprep.subr.mxu0 %v21_v26  ;;  %306 = vmatpush3.msra.mxu1 %v116_v29 }
  0x1f   :  { %275 = vmatpush3.msra.mxu0 %v21_v26  ;;  %307 = vmatprep.subr.mxu1 %v115_v31 }
  0x20   :  { %276 = vmatprep.subr.mxu0 %v20_v28  ;;  %308 = vmatpush3.msra.mxu1 %v115_v31 }
  0x21   :  { %277 = vmatpush3.msra.mxu0 %v20_v28  ;;  %309 = vmatprep.subr.mxu1 %v114_v32 }
  0x22   :  { %279 = vmatmul.mubr.f32.vlgmr.msra.gmra.mxu0 %v19_v30  ;;  %310 = vmatpush3.msra.mxu1 %v114_v32 }
  0x23   :  { %311 = vmatprep.subr.mxu1 %v113_v33 }
  0x24   :  { %312 = vmatpush3.msra.mxu1 %v113_v33 }
  0xe2   :  { %v280_v34 = vpop.f32.mrf.mxu0 }
  0xe3   :  { %v112_v37 = vmax.f32 %v280_v34, 0.0 }
  0xe4   :  { %v102_v35 = vpop.f32.mrf.mxu0 }
  0xe5   :  { %v111_v36 = vmax.f32 %v102_v35, 0.0 }
  0xe7   :  { %313 = vmatprep.mubr.f32.mxu1 %v111_v36 }
  0xe8   :  { %314 = vmatmul.mubr.f32.vlgmr.msra.gmra.mxu1 %v112_v37 }
 0x1a8   :  { %v315_v38 = vpop.f32.mrf.mxu1 }
 0x1a9   :  { %205 = vst [vmem:[%s453_s4 + $0x8] sm:$0xff] %v315_v38 }
 0x1aa   :  { %v195_v39 = vpop.f32.mrf.mxu1 }
 0x1ab   :  { %204 = vst [vmem:[%s453_s4] sm:$0xff] %v195_v39 }

</bundles_post_ra>
